<compile_context>
chip_gen: v7x
topology: tpu7x:2x2x1
jax: 0.10.0
libtpu: 0.0.40
codegen_flags: <defaults>
</compile_context>

<pallas_src>
import math
from functools import lru_cache

import numpy as np
import jax
import jax.numpy as jnp
from jax.experimental import pallas as pl
from jax.experimental.pallas import tpu as pltpu


_PI = math.pi
_PI_2 = math.pi / 2.0
_PI_4 = math.pi / 4.0
_TAN_PI_8 = 0.4142135623730950


def _atan_unit(t):
    """atan(t) for t in [0, 1] (Cephes atanf-style, ~1e-4 rad with approx recip)."""
    use_hi = t > _TAN_PI_8
    t2 = jnp.where(use_hi, (t - 1.0) * pl.reciprocal(t + 1.0, approx=True), t)
    z = t2 * t2
    p = ((((8.05374449538e-2 * z - 1.38776856032e-1) * z + 1.99777106478e-1) * z
          - 3.33329491539e-1) * z * t2 + t2)
    return jnp.where(use_hi, p + _PI_4, p)


def _atan2(y, x):
    """Elementwise atan2(y, x) from VPU ops + EUP reciprocal (in-kernel only)."""
    # TODO(synk): atan2(-0.0, x<0) returns +pi (torch.angle gives -pi); measure-zero set.
    abs_y = jnp.abs(y)
    abs_x = jnp.abs(x)
    num = jnp.minimum(abs_x, abs_y)
    den = jnp.maximum(abs_x, abs_y)
    den = jnp.where(den == 0.0, 1.0, den)
    t = num * pl.reciprocal(den, approx=True)        # in [0, 1]; 0 for (0, 0)
    r = _atan_unit(t)
    r = jnp.where(abs_y > abs_x, _PI_2 - r, r)       # fold octant -> quadrant I
    r = jnp.where(x < 0.0, _PI - r, r)               # quadrants II / III
    return jnp.where(y < 0.0, -r, r)                 # lower half plane


def _dft_kernel(x_ref, br_ref, bi_ref, ar_ref, ai_ref,
                re_ref, im_ref, mag_ref, ph_ref):
    bn, H, W = x_ref.shape
    Wkp = br_ref.shape[1]
    Hk = re_ref.shape[1]
    Wk = re_ref.shape[2]

    # --- stage 1: real DFT along W as two large 2-D MXU matmuls -------------
    x2 = x_ref[...].astype(jnp.float32).reshape(bn * H, W)
    yr = jnp.dot(x2, br_ref[...], preferred_element_type=jnp.float32)   # (bn*H, Wkp)
    yi = jnp.dot(x2, bi_ref[...], preferred_element_type=jnp.float32)
    yr3 = yr.reshape(bn, H, Wkp)
    yi3 = yi.reshape(bn, H, Wkp)

    # Repack samples along lanes (128-aligned pieces): (bn, H, Wkp) -> (H, bn*Wkp)
    yrT = jnp.concatenate([yr3[b] for b in range(bn)], axis=1)
    yiT = jnp.concatenate([yi3[b] for b in range(bn)], axis=1)

    # --- stage 2: full DFT along H, Gauss 3-multiplication complex product --
    ar = ar_ref[...]
    ai = ai_ref[...]
    t1 = jnp.dot(ar, yrT, preferred_element_type=jnp.float32)           # Ar @ Yr
    t2 = jnp.dot(ai, yiT, preferred_element_type=jnp.float32)           # Ai @ Yi
    t3 = jnp.dot(ar + ai, yrT + yiT, preferred_element_type=jnp.float32)
    zr = t1 - t2                       # (Hk, bn*Wkp), real part
    zi = t3 - t1 - t2                  # (Hk, bn*Wkp), imag part

    # --- epilogue on the lane-dense packed layout ----------------------------
    mag = jnp.sqrt(zr * zr + zi * zi)
    ph = _atan2(zi, zr)

    # --- unpack per sample and store only the true Wk frequencies -----------
    for b in range(bn):
        c0 = b * Wkp
        re_ref[b, :, :] = zr[:, c0:c0 + Wk]
        im_ref[b, :, :] = zi[:, c0:c0 + Wk]
        mag_ref[b, :, :] = mag[:, c0:c0 + Wk]
        ph_ref[b, :, :] = ph[:, c0:c0 + Wk]


@lru_cache(maxsize=None)
def _dft_bases(H, W, Hk, Wk, Wkp):
    """cos/sin DFT bases with the 1/(H*W) forward norm folded in (cached per shape)."""
    w = np.arange(W, dtype=np.float64)[:, None]
    f = np.arange(Wk, dtype=np.float64)[None, :]
    ang_w = (2.0 * np.pi / W) * np.mod(w * f, W)
    br = np.zeros((W, Wkp), np.float32)
    bi = np.zeros((W, Wkp), np.float32)
    br[:, :Wk] = (np.cos(ang_w) / W).astype(np.float32)
    bi[:, :Wk] = (-np.sin(ang_w) / W).astype(np.float32)

    k = np.arange(Hk, dtype=np.float64)[:, None]
    h = np.arange(H, dtype=np.float64)[None, :]
    ang_h = (2.0 * np.pi / H) * np.mod(k * h, H)
    ar = (np.cos(ang_h) / H).astype(np.float32)
    ai = (-np.sin(ang_h) / H).astype(np.float32)
    return jnp.asarray(br), jnp.asarray(bi), jnp.asarray(ar), jnp.asarray(ai)


def dft_transform(x, crop=None):
    """Pallas DFTTransform.forward.

    x: (N, C, H, W) real array.
    Returns (real, imag, magnitude, phase), each (N, C, Hk, Wk) float32 where
    (Hk, Wk) = crop (clamped) or (H, W//2 + 1).
    """
    N, C, H, W = x.shape
    wf_full = W // 2 + 1
    if crop is None:
        Hk, Wk = H, wf_full
    else:
        Hk, Wk = min(crop[0], H), min(crop[1], wf_full)
    Wkp = ((Wk + 127) // 128) * 128               # lane-dense internal frequency axis

    br, bi, ar, ai = _dft_bases(H, W, Hk, Wk, Wkp)

    NC = N * C
    x_flat = x.reshape(NC, H, W)

    # --- generation-aware VMEM sizing (v7x: 64 MiB/TC; v5e/v6e: 128 MiB) ----
    vmem_cap = 64 * 1024 * 1024
    try:
        info = pltpu.get_tpu_info()
        vmem_cap = int(getattr(info, "vmem_capacity_bytes", vmem_cap))
    except Exception:
        pass

    in_itemsize = jnp.dtype(x.dtype).itemsize
    per_slice = (H * W * (2 * in_itemsize + 4)    # double-buffered input block + f32 copy
                 + 5 * H * Wkp * 4                # Yr/Yi + lane-packed copies + temp
                 + 9 * Hk * Wkp * 4               # t1..t3, zr/zi, mag/ph + headroom
                 + 8 * Hk * Wk * 4)               # 4 double-buffered output blocks
    bases_bytes = (2 * W * Wkp + 3 * Hk * H) * 4

    budget = min(24 * 1024 * 1024, vmem_cap // 5)
    bn = max(1, min(NC, budget // max(per_slice, 1), 32))   # 32 bounds in-kernel unroll
    steps = pl.cdiv(NC, bn)
    steps = min(NC, max(steps, 4))                # >= 2 grid steps per TensorCore (v7x)
    if steps % 2 and steps < NC:
        steps += 1                                # even split across 2 cores
    bn = pl.cdiv(NC, steps)
    grid = (pl.cdiv(NC, bn),)

    vmem_limit = int(min(
        max(bn * per_slice + 2 * bases_bytes + (4 << 20), 16 * 1024 * 1024),
        (vmem_cap * 3) // 4))

    out_sds = jax.ShapeDtypeStruct((NC, Hk, Wk), jnp.float32)
    outs = pl.pallas_call(
        _dft_kernel,
        out_shape=(out_sds,) * 4,
        grid_spec=pltpu.PrefetchScalarGridSpec(
            num_scalar_prefetch=0,
            grid=grid,
            in_specs=[
                pl.BlockSpec((bn, H, W), lambda i: (i, 0, 0)),
                pl.BlockSpec((W, Wkp), lambda i: (0, 0)),
                pl.BlockSpec((W, Wkp), lambda i: (0, 0)),
                pl.BlockSpec((Hk, H), lambda i: (0, 0)),
                pl.BlockSpec((Hk, H), lambda i: (0, 0)),
            ],
            out_specs=(pl.BlockSpec((bn, Hk, Wk), lambda i: (i, 0, 0)),) * 4,
        ),
        compiler_params=pltpu.CompilerParams(
            dimension_semantics=("parallel",),
            vmem_limit_bytes=vmem_limit),
    )(x_flat, br, bi, ar, ai)

    real, imag, magnitude, phase = (o.reshape(N, C, Hk, Wk) for o in outs)
    return real, imag, magnitude, phase


if __name__ == "__main__":
    N, C, H, W = 2, 4, 16, 16
    key = jax.random.PRNGKey(0)
    x = jax.random.normal(key, (N, C, H, W), dtype=jnp.float32)

    real, imag, magnitude, phase = dft_transform(x, crop=None)
    jax.block_until_ready((real, imag, magnitude, phase))

    # Reference: rfft2 with 'forward' normalization (divide by H*W).
    ref = jnp.fft.rfft2(x) / (H * W)
    ref_re = jnp.real(ref)
    ref_im = jnp.imag(ref)
    ref_mag = jnp.abs(ref)
    ref_ph = jnp.angle(ref)

    Wf = W // 2 + 1
    assert real.shape == (N, C, H, Wf)
    assert imag.shape == (N, C, H, Wf)
    assert magnitude.shape == (N, C, H, Wf)
    assert phase.shape == (N, C, H, Wf)

    assert jnp.allclose(real, ref_re, atol=1e-3, rtol=1e-3), "real mismatch"
    assert jnp.allclose(imag, ref_im, atol=1e-3, rtol=1e-3), "imag mismatch"
    assert jnp.allclose(magnitude, ref_mag, atol=1e-3, rtol=1e-3), "magnitude mismatch"

    # Phase: compare modulo 2*pi (the +/-pi branch depends on the sign of a
    # ~1e-7 imaginary residual at purely-real bins) and only where |z| isn't tiny.
    d = jnp.abs(phase - ref_ph)
    d = jnp.minimum(d, 2.0 * _PI - d)
    phase_ok = jnp.where(ref_mag > 1e-2, d, 0.0) < 5e-2
    assert bool(jnp.all(phase_ok)), "phase mismatch"

    # Cropped path.
    ch, cw = 8, 5
    creal, cimag, cmag, cph = dft_transform(x, crop=(ch, cw))
    jax.block_until_ready((creal, cimag, cmag, cph))
    assert creal.shape == (N, C, ch, cw)
    assert jnp.allclose(creal, ref_re[:, :, :ch, :cw], atol=1e-3, rtol=1e-3), "crop real mismatch"
    assert jnp.allclose(cimag, ref_im[:, :, :ch, :cw], atol=1e-3, rtol=1e-3), "crop imag mismatch"
    assert jnp.allclose(cmag, ref_mag[:, :, :ch, :cw], atol=1e-3, rtol=1e-3), "crop magnitude mismatch"
    dc = jnp.abs(cph - ref_ph[:, :, :ch, :cw])
    dc = jnp.minimum(dc, 2.0 * _PI - dc)
    crop_phase_ok = jnp.where(ref_mag[:, :, :ch, :cw] > 1e-2, dc, 0.0) < 5e-2
    assert bool(jnp.all(crop_phase_ok)), "crop phase mismatch"

    print("KERNEL_OK")
</pallas_src>

<mosaic_0001>
module attributes {stable_mosaic.version = 11 : i64} {
  func.func @_dft_kernel(%arg0: i32, %arg1: memref<2x16x16xf32, #tpu.memory_space<vmem>>, %arg2: memref<16x128xf32, #tpu.memory_space<vmem>>, %arg3: memref<16x128xf32, #tpu.memory_space<vmem>>, %arg4: memref<16x16xf32, #tpu.memory_space<vmem>>, %arg5: memref<16x16xf32, #tpu.memory_space<vmem>>, %arg6: memref<2x16x9xf32, #tpu.memory_space<vmem>>, %arg7: memref<2x16x9xf32, #tpu.memory_space<vmem>>, %arg8: memref<2x16x9xf32, #tpu.memory_space<vmem>>, %arg9: memref<2x16x9xf32, #tpu.memory_space<vmem>>) attributes {dimension_semantics = [#tpu.dimension_semantics<parallel>], iteration_bounds = array<i64: 4>, scalar_prefetch = 0 : i64, scratch_operands = 0 : i64, tpu.core_type = #tpu.core_type<tc>, window_params = [{transform_indices = @transform_0, window_bounds = array<i64: 2, 16, 16>}, {pipeline_mode = #tpu.pipeline_mode<synchronous>, transform_indices = @transform_1, window_bounds = array<i64: 16, 128>}, {pipeline_mode = #tpu.pipeline_mode<synchronous>, transform_indices = @transform_2, window_bounds = array<i64: 16, 128>}, {pipeline_mode = #tpu.pipeline_mode<synchronous>, transform_indices = @transform_3, window_bounds = array<i64: 16, 16>}, {pipeline_mode = #tpu.pipeline_mode<synchronous>, transform_indices = @transform_4, window_bounds = array<i64: 16, 16>}, {transform_indices = @transform_5, window_bounds = array<i64: 2, 16, 9>}, {transform_indices = @transform_6, window_bounds = array<i64: 2, 16, 9>}, {transform_indices = @transform_7, window_bounds = array<i64: 2, 16, 9>}, {transform_indices = @transform_8, window_bounds = array<i64: 2, 16, 9>}]} {
    %c0 = arith.constant 0 : index
    %c0_0 = arith.constant 0 : index
    %c0_1 = arith.constant 0 : index
    %0 = vector.load %arg1[%c0, %c0_0, %c0_1] : memref<2x16x16xf32, #tpu.memory_space<vmem>>, vector<2x16x16xf32>
    %1 = vector.shape_cast %0 : vector<2x16x16xf32> to vector<32x16xf32>
    %c0_2 = arith.constant 0 : index
    %c0_3 = arith.constant 0 : index
    %2 = vector.load %arg2[%c0_2, %c0_3] : memref<16x128xf32, #tpu.memory_space<vmem>>, vector<16x128xf32>
    %cst = arith.constant dense<0.000000e+00> : vector<32x128xf32>
    %3 = tpu.matmul %1, %2, %cst {dimension_numbers = #tpu.dot_dimension_numbers<[1], [0], [0], [1], [0, 0, 1, 1], [], []>} : vector<32x16xf32>, vector<16x128xf32>, vector<32x128xf32> -> vector<32x128xf32>
    %c0_4 = arith.constant 0 : index
    %c0_5 = arith.constant 0 : index
    %4 = vector.load %arg3[%c0_4, %c0_5] : memref<16x128xf32, #tpu.memory_space<vmem>>, vector<16x128xf32>
    %cst_6 = arith.constant dense<0.000000e+00> : vector<32x128xf32>
    %5 = tpu.matmul %1, %4, %cst_6 {dimension_numbers = #tpu.dot_dimension_numbers<[1], [0], [0], [1], [0, 0, 1, 1], [], []>} : vector<32x16xf32>, vector<16x128xf32>, vector<32x128xf32> -> vector<32x128xf32>
    %6 = vector.shape_cast %3 : vector<32x128xf32> to vector<2x16x128xf32>
    %7 = vector.shape_cast %5 : vector<32x128xf32> to vector<2x16x128xf32>
    %8 = vector.extract_strided_slice %6 {offsets = [0, 0, 0], sizes = [1, 16, 128], strides = [1, 1, 1]} : vector<2x16x128xf32> to vector<1x16x128xf32>
    %9 = vector.shape_cast %8 : vector<1x16x128xf32> to vector<16x128xf32>
    %10 = vector.extract_strided_slice %6 {offsets = [1, 0, 0], sizes = [1, 16, 128], strides = [1, 1, 1]} : vector<2x16x128xf32> to vector<1x16x128xf32>
    %11 = vector.shape_cast %10 : vector<1x16x128xf32> to vector<16x128xf32>
    %12 = tpu.concatenate %9, %11 in 1 : vector<16x128xf32>, vector<16x128xf32> -> vector<16x256xf32>
    %13 = vector.extract_strided_slice %7 {offsets = [0, 0, 0], sizes = [1, 16, 128], strides = [1, 1, 1]} : vector<2x16x128xf32> to vector<1x16x128xf32>
    %14 = vector.shape_cast %13 : vector<1x16x128xf32> to vector<16x128xf32>
    %15 = vector.extract_strided_slice %7 {offsets = [1, 0, 0], sizes = [1, 16, 128], strides = [1, 1, 1]} : vector<2x16x128xf32> to vector<1x16x128xf32>
    %16 = vector.shape_cast %15 : vector<1x16x128xf32> to vector<16x128xf32>
    %17 = tpu.concatenate %14, %16 in 1 : vector<16x128xf32>, vector<16x128xf32> -> vector<16x256xf32>
    %c0_7 = arith.constant 0 : index
    %c0_8 = arith.constant 0 : index
    %18 = vector.load %arg4[%c0_7, %c0_8] : memref<16x16xf32, #tpu.memory_space<vmem>>, vector<16x16xf32>
    %c0_9 = arith.constant 0 : index
    %c0_10 = arith.constant 0 : index
    %19 = vector.load %arg5[%c0_9, %c0_10] : memref<16x16xf32, #tpu.memory_space<vmem>>, vector<16x16xf32>
    %cst_11 = arith.constant dense<0.000000e+00> : vector<16x256xf32>
    %20 = tpu.matmul %18, %12, %cst_11 {dimension_numbers = #tpu.dot_dimension_numbers<[1], [0], [0], [1], [0, 0, 1, 1], [], []>} : vector<16x16xf32>, vector<16x256xf32>, vector<16x256xf32> -> vector<16x256xf32>
    %cst_12 = arith.constant dense<0.000000e+00> : vector<16x256xf32>
    %21 = tpu.matmul %19, %17, %cst_12 {dimension_numbers = #tpu.dot_dimension_numbers<[1], [0], [0], [1], [0, 0, 1, 1], [], []>} : vector<16x16xf32>, vector<16x256xf32>, vector<16x256xf32> -> vector<16x256xf32>
    %22 = arith.addf %18, %19 : vector<16x16xf32>
    %23 = arith.addf %12, %17 : vector<16x256xf32>
    %cst_13 = arith.constant dense<0.000000e+00> : vector<16x256xf32>
    %24 = tpu.matmul %22, %23, %cst_13 {dimension_numbers = #tpu.dot_dimension_numbers<[1], [0], [0], [1], [0, 0, 1, 1], [], []>} : vector<16x16xf32>, vector<16x256xf32>, vector<16x256xf32> -> vector<16x256xf32>
    %25 = arith.subf %20, %21 : vector<16x256xf32>
    %26 = arith.subf %24, %20 : vector<16x256xf32>
    %27 = arith.subf %26, %21 : vector<16x256xf32>
    %28 = arith.mulf %25, %25 : vector<16x256xf32>
    %29 = arith.mulf %27, %27 : vector<16x256xf32>
    %30 = arith.addf %28, %29 : vector<16x256xf32>
    %31 = math.sqrt %30 : vector<16x256xf32>
    %32 = math.absf %27 : vector<16x256xf32>
    %33 = math.absf %25 : vector<16x256xf32>
    %34 = arith.minimumf %33, %32 : vector<16x256xf32>
    %35 = arith.maximumf %33, %32 : vector<16x256xf32>
    %cst_14 = arith.constant 0.000000e+00 : f32
    %36 = vector.broadcast %cst_14 : f32 to vector<16x256xf32>
    %37 = arith.cmpf oeq, %35, %36 : vector<16x256xf32>
    %cst_15 = arith.constant 1.000000e+00 : f32
    %38 = vector.broadcast %cst_15 : f32 to vector<16x256xf32>
    %39 = arith.select %37, %38, %35 : vector<16x256xi1>, vector<16x256xf32>
    %40 = tpu.reciprocal %39 {approx = true} : vector<16x256xf32> -> vector<16x256xf32>
    %41 = arith.mulf %34, %40 : vector<16x256xf32>
    %cst_16 = arith.constant 0.414213568 : f32
    %42 = vector.broadcast %cst_16 : f32 to vector<16x256xf32>
    %43 = arith.cmpf ogt, %41, %42 : vector<16x256xf32>
    %cst_17 = arith.constant 1.000000e+00 : f32
    %44 = vector.broadcast %cst_17 : f32 to vector<16x256xf32>
    %45 = arith.subf %41, %44 : vector<16x256xf32>
    %cst_18 = arith.constant 1.000000e+00 : f32
    %46 = vector.broadcast %cst_18 : f32 to vector<16x256xf32>
    %47 = arith.addf %41, %46 : vector<16x256xf32>
    %48 = tpu.reciprocal %47 {approx = true} : vector<16x256xf32> -> vector<16x256xf32>
    %49 = arith.mulf %45, %48 : vector<16x256xf32>
    %50 = arith.select %43, %49, %41 : vector<16x256xi1>, vector<16x256xf32>
    %51 = arith.mulf %50, %50 : vector<16x256xf32>
    %cst_19 = arith.constant 0.0805374458 : f32
    %52 = vector.broadcast %cst_19 : f32 to vector<16x256xf32>
    %53 = arith.mulf %52, %51 : vector<16x256xf32>
    %cst_20 = arith.constant 0.138776854 : f32
    %54 = vector.broadcast %cst_20 : f32 to vector<16x256xf32>
    %55 = arith.subf %53, %54 : vector<16x256xf32>
    %56 = arith.mulf %55, %51 : vector<16x256xf32>
    %cst_21 = arith.constant 0.199777111 : f32
    %57 = vector.broadcast %cst_21 : f32 to vector<16x256xf32>
    %58 = arith.addf %56, %57 : vector<16x256xf32>
    %59 = arith.mulf %58, %51 : vector<16x256xf32>
    %cst_22 = arith.constant 0.333329499 : f32
    %60 = vector.broadcast %cst_22 : f32 to vector<16x256xf32>
    %61 = arith.subf %59, %60 : vector<16x256xf32>
    %62 = arith.mulf %61, %51 : vector<16x256xf32>
    %63 = arith.mulf %62, %50 : vector<16x256xf32>
    %64 = arith.addf %63, %50 : vector<16x256xf32>
    %cst_23 = arith.constant 0.785398185 : f32
    %65 = vector.broadcast %cst_23 : f32 to vector<16x256xf32>
    %66 = arith.addf %64, %65 : vector<16x256xf32>
    %67 = arith.select %43, %66, %64 : vector<16x256xi1>, vector<16x256xf32>
    %68 = arith.cmpf ogt, %32, %33 : vector<16x256xf32>
    %cst_24 = arith.constant 1.57079637 : f32
    %69 = vector.broadcast %cst_24 : f32 to vector<16x256xf32>
    %70 = arith.subf %69, %67 : vector<16x256xf32>
    %71 = arith.select %68, %70, %67 : vector<16x256xi1>, vector<16x256xf32>
    %cst_25 = arith.constant 0.000000e+00 : f32
    %72 = vector.broadcast %cst_25 : f32 to vector<16x256xf32>
    %73 = arith.cmpf olt, %25, %72 : vector<16x256xf32>
    %cst_26 = arith.constant 3.14159274 : f32
    %74 = vector.broadcast %cst_26 : f32 to vector<16x256xf32>
    %75 = arith.subf %74, %71 : vector<16x256xf32>
    %76 = arith.select %73, %75, %71 : vector<16x256xi1>, vector<16x256xf32>
    %cst_27 = arith.constant 0.000000e+00 : f32
    %77 = vector.broadcast %cst_27 : f32 to vector<16x256xf32>
    %78 = arith.cmpf olt, %27, %77 : vector<16x256xf32>
    %cst_28 = arith.constant 0.000000e+00 : f32
    %79 = vector.broadcast %cst_28 : f32 to vector<16x256xf32>
    %80 = arith.subf %79, %76 : vector<16x256xf32>
    %81 = arith.select %78, %80, %76 : vector<16x256xi1>, vector<16x256xf32>
    %82 = vector.extract_strided_slice %25 {offsets = [0, 0], sizes = [16, 9], strides = [1, 1]} : vector<16x256xf32> to vector<16x9xf32>
    %c0_29 = arith.constant 0 : index
    %c0_30 = arith.constant 0 : index
    %c0_31 = arith.constant 0 : index
    %83 = vector.load %arg6[%c0_29, %c0_30, %c0_31] : memref<2x16x9xf32, #tpu.memory_space<vmem>>, vector<1x16x9xf32>
    %84 = vector.shape_cast %83 : vector<1x16x9xf32> to vector<16x9xf32>
    %85 = vector.shape_cast %82 : vector<16x9xf32> to vector<1x16x9xf32>
    tpu.vector_store %arg6[%c0_29, %c0_30, %c0_31], %85 {strides = array<i32>} : memref<2x16x9xf32, #tpu.memory_space<vmem>>, vector<1x16x9xf32>,
    %86 = vector.extract_strided_slice %27 {offsets = [0, 0], sizes = [16, 9], strides = [1, 1]} : vector<16x256xf32> to vector<16x9xf32>
    %c0_32 = arith.constant 0 : index
    %c0_33 = arith.constant 0 : index
    %c0_34 = arith.constant 0 : index
    %87 = vector.load %arg7[%c0_32, %c0_33, %c0_34] : memref<2x16x9xf32, #tpu.memory_space<vmem>>, vector<1x16x9xf32>
    %88 = vector.shape_cast %87 : vector<1x16x9xf32> to vector<16x9xf32>
    %89 = vector.shape_cast %86 : vector<16x9xf32> to vector<1x16x9xf32>
    tpu.vector_store %arg7[%c0_32, %c0_33, %c0_34], %89 {strides = array<i32>} : memref<2x16x9xf32, #tpu.memory_space<vmem>>, vector<1x16x9xf32>,
    %90 = vector.extract_strided_slice %31 {offsets = [0, 0], sizes = [16, 9], strides = [1, 1]} : vector<16x256xf32> to vector<16x9xf32>
    %c0_35 = arith.constant 0 : index
    %c0_36 = arith.constant 0 : index
    %c0_37 = arith.constant 0 : index
    %91 = vector.load %arg8[%c0_35, %c0_36, %c0_37] : memref<2x16x9xf32, #tpu.memory_space<vmem>>, vector<1x16x9xf32>
    %92 = vector.shape_cast %91 : vector<1x16x9xf32> to vector<16x9xf32>
    %93 = vector.shape_cast %90 : vector<16x9xf32> to vector<1x16x9xf32>
    tpu.vector_store %arg8[%c0_35, %c0_36, %c0_37], %93 {strides = array<i32>} : memref<2x16x9xf32, #tpu.memory_space<vmem>>, vector<1x16x9xf32>,
    %94 = vector.extract_strided_slice %81 {offsets = [0, 0], sizes = [16, 9], strides = [1, 1]} : vector<16x256xf32> to vector<16x9xf32>
    %c0_38 = arith.constant 0 : index
    %c0_39 = arith.constant 0 : index
    %c0_40 = arith.constant 0 : index
    %95 = vector.load %arg9[%c0_38, %c0_39, %c0_40] : memref<2x16x9xf32, #tpu.memory_space<vmem>>, vector<1x16x9xf32>
    %96 = vector.shape_cast %95 : vector<1x16x9xf32> to vector<16x9xf32>
    %97 = vector.shape_cast %94 : vector<16x9xf32> to vector<1x16x9xf32>
    tpu.vector_store %arg9[%c0_38, %c0_39, %c0_40], %97 {strides = array<i32>} : memref<2x16x9xf32, #tpu.memory_space<vmem>>, vector<1x16x9xf32>,
    %98 = vector.extract_strided_slice %25 {offsets = [0, 128], sizes = [16, 9], strides = [1, 1]} : vector<16x256xf32> to vector<16x9xf32>
    %c1 = arith.constant 1 : index
    %c0_41 = arith.constant 0 : index
    %c0_42 = arith.constant 0 : index
    %99 = vector.load %arg6[%c1, %c0_41, %c0_42] : memref<2x16x9xf32, #tpu.memory_space<vmem>>, vector<1x16x9xf32>
    %100 = vector.shape_cast %99 : vector<1x16x9xf32> to vector<16x9xf32>
    %101 = vector.shape_cast %98 : vector<16x9xf32> to vector<1x16x9xf32>
    tpu.vector_store %arg6[%c1, %c0_41, %c0_42], %101 {strides = array<i32>} : memref<2x16x9xf32, #tpu.memory_space<vmem>>, vector<1x16x9xf32>,
    %102 = vector.extract_strided_slice %27 {offsets = [0, 128], sizes = [16, 9], strides = [1, 1]} : vector<16x256xf32> to vector<16x9xf32>
    %c1_43 = arith.constant 1 : index
    %c0_44 = arith.constant 0 : index
    %c0_45 = arith.constant 0 : index
    %103 = vector.load %arg7[%c1_43, %c0_44, %c0_45] : memref<2x16x9xf32, #tpu.memory_space<vmem>>, vector<1x16x9xf32>
    %104 = vector.shape_cast %103 : vector<1x16x9xf32> to vector<16x9xf32>
    %105 = vector.shape_cast %102 : vector<16x9xf32> to vector<1x16x9xf32>
    tpu.vector_store %arg7[%c1_43, %c0_44, %c0_45], %105 {strides = array<i32>} : memref<2x16x9xf32, #tpu.memory_space<vmem>>, vector<1x16x9xf32>,
    %106 = vector.extract_strided_slice %31 {offsets = [0, 128], sizes = [16, 9], strides = [1, 1]} : vector<16x256xf32> to vector<16x9xf32>
    %c1_46 = arith.constant 1 : index
    %c0_47 = arith.constant 0 : index
    %c0_48 = arith.constant 0 : index
    %107 = vector.load %arg8[%c1_46, %c0_47, %c0_48] : memref<2x16x9xf32, #tpu.memory_space<vmem>>, vector<1x16x9xf32>
    %108 = vector.shape_cast %107 : vector<1x16x9xf32> to vector<16x9xf32>
    %109 = vector.shape_cast %106 : vector<16x9xf32> to vector<1x16x9xf32>
    tpu.vector_store %arg8[%c1_46, %c0_47, %c0_48], %109 {strides = array<i32>} : memref<2x16x9xf32, #tpu.memory_space<vmem>>, vector<1x16x9xf32>,
    %110 = vector.extract_strided_slice %81 {offsets = [0, 128], sizes = [16, 9], strides = [1, 1]} : vector<16x256xf32> to vector<16x9xf32>
    %c1_49 = arith.constant 1 : index
    %c0_50 = arith.constant 0 : index
    %c0_51 = arith.constant 0 : index
    %111 = vector.load %arg9[%c1_49, %c0_50, %c0_51] : memref<2x16x9xf32, #tpu.memory_space<vmem>>, vector<1x16x9xf32>
    %112 = vector.shape_cast %111 : vector<1x16x9xf32> to vector<16x9xf32>
    %113 = vector.shape_cast %110 : vector<16x9xf32> to vector<1x16x9xf32>
    tpu.vector_store %arg9[%c1_49, %c0_50, %c0_51], %113 {strides = array<i32>} : memref<2x16x9xf32, #tpu.memory_space<vmem>>, vector<1x16x9xf32>,
    return
  }
  func.func @transform_0(%arg0: i32) -> (i32, i32, i32) {
    %c0_i32 = arith.constant 0 : i32
    %c0_i32_0 = arith.constant 0 : i32
    %c0_i32_1 = arith.constant 0 : i32
    return %arg0, %c0_i32, %c0_i32_0 : i32, i32, i32
  }
  func.func @transform_1(%arg0: i32) -> (i32, i32) {
    %c0_i32 = arith.constant 0 : i32
    %c0_i32_0 = arith.constant 0 : i32
    %c0_i32_1 = arith.constant 0 : i32
    return %c0_i32, %c0_i32_0 : i32, i32
  }
  func.func @transform_2(%arg0: i32) -> (i32, i32) {
    %c0_i32 = arith.constant 0 : i32
    %c0_i32_0 = arith.constant 0 : i32
    %c0_i32_1 = arith.constant 0 : i32
    return %c0_i32, %c0_i32_0 : i32, i32
  }
  func.func @transform_3(%arg0: i32) -> (i32, i32) {
    %c0_i32 = arith.constant 0 : i32
    %c0_i32_0 = arith.constant 0 : i32
    %c0_i32_1 = arith.constant 0 : i32
    return %c0_i32, %c0_i32_0 : i32, i32
  }
  func.func @transform_4(%arg0: i32) -> (i32, i32) {
    %c0_i32 = arith.constant 0 : i32
    %c0_i32_0 = arith.constant 0 : i32
    %c0_i32_1 = arith.constant 0 : i32
    return %c0_i32, %c0_i32_0 : i32, i32
  }
  func.func @transform_5(%arg0: i32) -> (i32, i32, i32) {
    %c0_i32 = arith.constant 0 : i32
    %c0_i32_0 = arith.constant 0 : i32
    %c0_i32_1 = arith.constant 0 : i32
    return %arg0, %c0_i32, %c0_i32_0 : i32, i32, i32
  }
  func.func @transform_6(%arg0: i32) -> (i32, i32, i32) {
    %c0_i32 = arith.constant 0 : i32
    %c0_i32_0 = arith.constant 0 : i32
    %c0_i32_1 = arith.constant 0 : i32
    return %arg0, %c0_i32, %c0_i32_0 : i32, i32, i32
  }
  func.func @transform_7(%arg0: i32) -> (i32, i32, i32) {
    %c0_i32 = arith.constant 0 : i32
    %c0_i32_0 = arith.constant 0 : i32
    %c0_i32_1 = arith.constant 0 : i32
    return %arg0, %c0_i32, %c0_i32_0 : i32, i32, i32
  }
  func.func @transform_8(%arg0: i32) -> (i32, i32, i32) {
    %c0_i32 = arith.constant 0 : i32
    %c0_i32_0 = arith.constant 0 : i32
    %c0_i32_1 = arith.constant 0 : i32
    return %arg0, %c0_i32, %c0_i32_0 : i32, i32, i32
  }
}

</mosaic_0001>

<bundles_post_ra>
// kernel: tpu_custom_call.1
= control target key start
LH: loop header
LB: loop body
LE: loop exit
PB: predicated region body
PF: predicated region fallthrough
CT: control target
= control target key end

     0   :  { %14 = vsyncpa [#allocation3], 0  ;;  %s2247_s0 = inlined_call_operand.hbm [shape: f32[8,16,16], index: 0, kind: input, shape index: {}]   ;;  %s2248_s1 = inlined_call_operand.hbm [shape: f32[16,128], index: 1, kind: input, shape index: {}]   ;;  %s2249_s2 = inlined_call_operand.hbm [shape: f32[16,128], index: 2, kind: input, shape index: {}]   ;;  %s2250_s3 = inlined_call_operand.hbm [shape: f32[16,16], index: 3, kind: input, shape index: {}]   ;;  %s2251_s4 = inlined_call_operand.hbm [shape: f32[16,16], index: 4, kind: input, shape index: {}]   ;;  %s2252_s5 = inlined_call_operand.vmem [shape: f32[8,16,9], index: 5, kind: output, shape index: {0}]   ;;  %s2253_s6 = inlined_call_operand.vmem [shape: f32[8,16,9], index: 6, kind: output, shape index: {1}]   ;;  %s2254_s7 = inlined_call_operand.vmem [shape: f32[8,16,9], index: 7, kind: output, shape index: {2}]   ;;  %s2255_s8 = inlined_call_operand.vmem [shape: f32[8,16,9], index: 8, kind: output, shape index: {3}]  }
   0x1   :  { %16 = vsyncpa [#allocation3 + $0x1], 0 }
   0x2   :  { %17 = vsyncpa [#allocation5], 0 }
   0x3   :  { %18 = vsyncpa [#allocation8], 0  ;;  %s1785_s27 = smov 0   ;;  %s1787_s28 = smov 0  }
   0x4   :  { %s1789_s29 = smov 0   ;;  %s1791_s30 = smov 0  }
   0x5 LB: > { %s2258_s9 = sadd.s32 4294967295, %s1730_s30   ;;  %p44_p0 = scmp.ne.s32.totalorder %s1722_s28, %s1718_s27  ;;  %s1730_s30 = sphi %s1791_s30, %s2274_s30   ;;  %s1726_s29 = sphi %s1789_s29, %s2273_s29   ;;  %s1722_s28 = sphi %s1787_s28, %s2272_s28   ;;  %s1718_s27 = sphi %s1785_s27, %s2271_s27  }
   0x6   : > { %p1807_p1 = scmp.eq.s32.totalorder %s2258_s9, 0  ;;  %p1315_p2 = scmp.ge.s32.totalorder %s1730_s30, 1 }
   0x7   : > { %p243_p3 = scmp.lt.s32.totalorder %s1730_s30, 5  ;;  %s1732_s13 = smov [#allocation4]  }
   0x8   : > { %s2261_s10 = scalar_select %p1807_p1, 1, 0 }
   0x9   : > { %p1815_p4 = por %p1807_p1, %p44_p0  ;;  %p1819_p5 = pnand %p1315_p2, %p243_p3 }
   0xa   : > { %s255_s14 = sshll.u32 %s1732_s13, 4  ;;  %s1733_s16 = smov [#allocation7]   ;;  %s1823_s14 = int_to_ptr.vmem [resolvable:$true] %s255_s14 }
   0xb   : > { %s2262_s11 = scalar_select %p1815_p4, 1, 0 }
   0xc   : > { %s2263_s12 = scalar_select %p1819_p5, 1, 0 }
   0xd   : > { %p1457_p6 = pneg %p1819_p5  ;;  %s281_s17 = sshll.u32 %s1733_s16, 4  ;;  %s1833_s17 = int_to_ptr.vmem [resolvable:$true] %s281_s17 }
   0xe   : > { %s1734_s18 = smov [#allocation6]   ;;  %s1546_s22 = scalar_lea.hbm %s2248_s1, 256 }
   0xf   : > { %p1829_p7 = pnand %p1457_p6, %p1807_p1  ;;  %s1835_s19 = sshll.u32 %s1734_s18, 4  ;;  %s269_s19 = int_to_ptr.vmem [resolvable:$true] %s1835_s19 }
  0x10   : > { %p1547_p8 = scmp.ne.s32.totalorder %s2248_s1, %s1546_s22  ;;  %p1553_p12 = scmp.lt.u32.totalorder %s1546_s22, %s2248_s1 }
  0x11   : > { %p1845_p9 = pneg %p1829_p7 }
  0x13   : > { %p1549_p10 = pnand %p1845_p9, %p1547_p8 }
  0x15   : > { %p1550_p11 = pneg %p1549_p10 }
  0x17   : > { %p1555_p13 = pnand %p1553_p12, %p1550_p11 }
  0x19   : > { %1558 = shalt.err (!%p1555_p13)
}
  0x1a   : > { %s1559_s13 = scalar_lea.vmem %s1823_s14, 256  ;;  %p1567_p6 = scmp.lt.s32.totalorder %s1823_s14, %s1823_s14 }
  0x1b   : > { %p1560_p0 = scmp.ne.s32.totalorder %s1823_s14, %s1559_s13  ;;  %p1568_p1 = scmp.lt.s32.totalorder %s1559_s13, %s1559_s13 }
  0x1d   : > { %p1562_p2 = pnand %p1560_p0, %p1845_p9  ;;  %p1569_p8 = por %p1568_p1, %p1567_p6 }
  0x1f   : > { %p1563_p3 = pneg %p1562_p2 }
  0x21   : > { %p1570_p10 = pnand %p1569_p8, %p1563_p3 }
  0x23   : > { %1573 = shalt.err (!%p1570_p10)
}
  0x24   : > { %s1735_s16 = smov 128   ;;  %s1736_s18 = smov 8  }
  0x25   : > { %1460 = dma.hbm_to_vmem [thread:$0]  (!%p1829_p7), %s2248_s1, 256, %s1823_s14, [#allocation5], %s1735_s16, %s1735_s16, %s1736_s18  }
  0x26   : > { %s1574_s24 = scalar_lea.hbm %s2250_s3, 256 }
  0x27   : > { %p1575_p1 = scmp.ne.s32.totalorder %s2250_s3, %s1574_s24  ;;  %p1581_p13 = scmp.lt.u32.totalorder %s1574_s24, %s2250_s3 }
  0x29   : > { %p1577_p11 = pnand %p1575_p1, %p1845_p9 }
  0x2b   : > { %p1578_p12 = pneg %p1577_p11 }
  0x2d   : > { %p1583_p0 = pnand %p1581_p13, %p1578_p12 }
  0x2f   : > { %1586 = shalt.err (!%p1583_p0)
}
  0x30   : > { %s1587_s14 = scalar_lea.vmem %s1833_s17, 256  ;;  %p1595_p8 = scmp.lt.s32.totalorder %s1833_s17, %s1833_s17 }
  0x31   : > { %p1588_p2 = scmp.ne.s32.totalorder %s1833_s17, %s1587_s14  ;;  %p1596_p10 = scmp.lt.s32.totalorder %s1587_s14, %s1587_s14 }
  0x33   : > { %p1590_p3 = pnand %p1588_p2, %p1845_p9  ;;  %p1597_p1 = por %p1596_p10, %p1595_p8 }
  0x35   : > { %p1591_p6 = pneg %p1590_p3 }
  0x37   : > { %p1598_p11 = pnand %p1597_p1, %p1591_p6 }
  0x39   : > { %1601 = shalt.err (!%p1598_p11)
}
  0x3a   : > { %1466 = dma.hbm_to_vmem [thread:$0]  (!%p1829_p7), %s2250_s3, 256, %s1833_s17, [#allocation8], %s1735_s16, %s1735_s16, %s1736_s18  }
  0x3b   : > { %s1602_s23 = scalar_lea.hbm %s2249_s2, 256 }
  0x3c   : > { %p1603_p12 = scmp.ne.s32.totalorder %s2249_s2, %s1602_s23  ;;  %p1609_p2 = scmp.lt.u32.totalorder %s1602_s23, %s2249_s2 }
  0x3e   : > { %p1605_p13 = pnand %p1603_p12, %p1845_p9 }
  0x40   : > { %p1606_p0 = pneg %p1605_p13 }
  0x42   : > { %p1611_p3 = pnand %p1609_p2, %p1606_p0 }
  0x44   : > { %1614 = shalt.err (!%p1611_p3)
}
  0x45   : > { %s1615_s14 = scalar_lea.vmem %s269_s19, 256  ;;  %p1623_p1 = scmp.lt.s32.totalorder %s269_s19, %s269_s19 }
  0x46   : > { %p1616_p6 = scmp.ne.s32.totalorder %s269_s19, %s1615_s14  ;;  %p1624_p11 = scmp.lt.s32.totalorder %s1615_s14, %s1615_s14 }
  0x48   : > { %p1618_p8 = pnand %p1616_p6, %p1845_p9  ;;  %p1625_p4 = por %p1624_p11, %p1623_p1 }
  0x4a   : > { %p1619_p10 = pneg %p1618_p8 }
  0x4c   : > { %p1626_p5 = pnand %p1625_p4, %p1619_p10 }
  0x4e   : > { %1629 = shalt.err (!%p1626_p5)
}
  0x4f   : > { %1463 = dma.hbm_to_vmem [thread:$0]  (!%p1829_p7), %s2249_s2, 256, %s269_s19, [#allocation5], %s1735_s16, %s1735_s16, %s1736_s18  }
  0x50   : > { %s1737_s20 = smov [#allocation9]   ;;  %s1630_s24 = scalar_lea.hbm %s2251_s4, 256 }
  0x51   : > { %s294_s21 = sshll.u32 %s1737_s20, 4  ;;  %p1631_p4 = scmp.ne.s32.totalorder %s2251_s4, %s1630_s24  ;;  %s295_s21 = int_to_ptr.vmem [resolvable:$true] %s294_s21 }
  0x52   : > { %p1637_p13 = scmp.lt.u32.totalorder %s1630_s24, %s2251_s4 }
  0x53   : > { %p1633_p5 = pnand %p1631_p4, %p1845_p9 }
  0x55   : > { %p1634_p12 = pneg %p1633_p5 }
  0x57   : > { %p1639_p0 = pnand %p1637_p13, %p1634_p12 }
  0x59   : > { %1642 = shalt.err (!%p1639_p0)
}
  0x5a   : > { %s1643_s19 = scalar_lea.vmem %s295_s21, 256  ;;  %p1651_p8 = scmp.lt.s32.totalorder %s295_s21, %s295_s21 }
  0x5b   : > { %p1644_p2 = scmp.ne.s32.totalorder %s295_s21, %s1643_s19  ;;  %p1652_p10 = scmp.lt.s32.totalorder %s1643_s19, %s1643_s19 }
  0x5d   : > { %p1646_p3 = pnand %p1644_p2, %p1845_p9  ;;  %p1653_p1 = por %p1652_p10, %p1651_p8 }
  0x5f   : > { %p1647_p6 = pneg %p1646_p3 }
  0x61   : > { %p1654_p11 = pnand %p1653_p1, %p1647_p6 }
  0x63   : > { %1657 = shalt.err (!%p1654_p11)
}
  0x64   : > { %1469 = dma.hbm_to_vmem [thread:$0]  (!%p1829_p7), %s2251_s4, 256, %s295_s21, [#allocation8], %s1735_s16, %s1735_s16, %s1736_s18  }
  0x65   : > { %s1939_s25 = sadd.s32 1, %s1730_s30   ;;  %s31_s15 = sadd.s32 1, %s1726_s29 }
  0x66   : > { %s28_s20 = ssub.s32 %s1730_s30, %s1939_s25  ;;  %p38_p9 = scmp.ne.s32.totalorder %s1726_s29, %s1722_s28 }
  0x67   : > { %p29_p4 = scmp.eq.s32.totalorder %s28_s20, 0  ;;  %p39_p5 = scmp.eq.s32.totalorder %s1730_s30, 0 }
  0x68   : > { %p1478_p12 = scmp.lt.s32.totalorder %s1730_s30, 4  ;;  %s308_s22 = sand.u32 1, %s1726_s29  }
  0x69   : > { %s1950_s23 = scalar_select %p29_p4, %s1726_s29, %s31_s15  }
  0x6a   : > { %p40_p13 = por %p39_p5, %p38_p9  ;;  %s1321_s24 = sshll.u32 %s308_s22, 5 }
  0x6b   : > { %s1380_s26 = sshll.u32 %s1730_s30, 9  ;;  %s312_s21 = scalar_lea.vmem [#allocation2], %s1321_s24 }
  0x6c   : > { %s1956_s14 = scalar_lea.hbm %s2247_s0, %s1380_s26  ;;  %s320_s19 = sshll.u32 %s312_s21, 4  ;;  %s1962_s19 = int_to_ptr.vmem [resolvable:$true] %s320_s19 }
  0x6d   : > { %p1958_p7 = pnand %p1478_p12, %p40_p13  ;;  %s1964_s9 = scalar_lea.sflag [#allocation3], %s308_s22 }
  0x6e   : > { %s1658_s15 = scalar_lea.hbm %s1956_s14, 512  ;;  %s1663_s26 = scalar_lea.hbm %s2247_s0, 2048 }
  0x6f   : > { %p1659_p0 = scmp.ne.s32.totalorder %s1956_s14, %s1658_s15  ;;  %p1660_p2 = pneg %p1958_p7 }
  0x70   : > { %p1664_p8 = scmp.lt.u32.totalorder %s1956_s14, %s2247_s0  ;;  %p1665_p10 = scmp.lt.u32.totalorder %s1663_s26, %s1658_s15 }
  0x71   : > { %p1661_p3 = pnand %p1660_p2, %p1659_p0  ;;  %p1667_p11 = scmp.lt.u32.totalorder %s1658_s15, %s1956_s14 }
  0x72   : > { %p1666_p1 = por %p1665_p10, %p1664_p8 }
  0x73   : > { %p1662_p6 = pneg %p1661_p3 }
  0x74   : > { %p1668_p9 = por %p1667_p11, %p1666_p1 }
  0x76   : > { %p1669_p4 = pnand %p1668_p9, %p1662_p6 }
  0x78   : > { %1672 = shalt.err (!%p1669_p4)
}
  0x79   : > { %s1673_s22 = scalar_lea.vmem %s1962_s19, 512  ;;  %s1738_s21 = smov [#allocation2]  }
  0x7a   : > { %p1674_p5 = scmp.ne.s32.totalorder %s1962_s19, %s1673_s22  ;;  %s1678_s20 = sshll.u32 %s1738_s21, 4  ;;  %s1679_s20 = int_to_ptr.vmem [resolvable:$false] %s1678_s20 }
  0x7b   : > { %s1680_s24 = scalar_lea.vmem %s1679_s20, 1024  ;;  %p1681_p0 = scmp.lt.s32.totalorder %s1962_s19, %s1679_s20 }
  0x7c   : > { %p1676_p12 = pnand %p1674_p5, %p1660_p2  ;;  %p1682_p3 = scmp.lt.s32.totalorder %s1680_s24, %s1673_s22 }
  0x7e   : > { %p1677_p13 = pneg %p1676_p12  ;;  %p1683_p8 = por %p1682_p3, %p1681_p0 }
  0x80   : > { %p1684_p10 = pnand %p1683_p8, %p1677_p13 }
  0x82   : > { %1687 = shalt.err (!%p1684_p10)
}
  0x83   : > { %1473 = dma.hbm_to_vmem [thread:$0]  (!%p1958_p7), %s1956_s14, 512, %s1962_s19, %s1964_s9, %s1735_s16, %s1735_s16, %s1736_s18  }
  0x84   : > { %p2267_p2 = scmp.ne.s32.totalorder %s2263_s12, 0 }
  0x85   : > { %s334_s15 = sand.u32 (!%p2267_p2), 1, %s1722_s28   ;;  %p2268_p6 = scmp.ne.s32.totalorder (!%p2267_p2), %s2262_s11, 0 }
  0x86   : > { %332 = sbr.rel (%p2267_p2) target bundleno = 684 (0x2ac), region = 40  ;;  %s1326_s26 = sshll.u32 (!%p2267_p2), %s334_s15, 5 }
  0x87   : > { %s335_s27 = scalar_lea.sflag (!%p2267_p2), [#allocation3], %s334_s15  ;;  %s338_s13 = scalar_lea.vmem (!%p2267_p2), [#allocation2], %s1326_s26 }
  0x8d   : > { %1705 = dma.done.wait (%p2268_p6), %s335_s27, 512  }
  0x8e   : > { %1707 = vsyncadd (%p2268_p6), %s335_s27, 4294966784  ;;  %p2269_p1 = scmp.ne.s32.totalorder %s2261_s10, 0 }
  0x90   : > { %1709 = dma.done.wait (%p2269_p1), [#allocation5], 512  }
  0x91   : > { %1711 = vsyncadd (%p2269_p1), [#allocation5], 4294966784 }
  0x92   : > { %1713 = dma.done.wait (%p2269_p1), [#allocation8], 512  }
  0x93   : > { %1715 = vsyncadd (%p2269_p1), [#allocation8], 4294966784  ;;  %vm441_vm0 = vcmask 130048   ;;  %v439_v0 = vld [vmem:[#allocation4] sm:$0xff]  ;;  %v440_v1 = vld [vmem:[#allocation4 + $0x8] sm:$0xff]  ;;  %v1739_v10 = vmov 0.0  }
  0x94   : > { %v437_v2 = vld [vmem:[%s338_s13 + $0x10] sm:$0xff]  ;;  %v1417_v3 = vpack.c.bf16 %v440_v1, %v439_v0  ;;  %v540_v5 = vld [vmem:[#allocation6 + $0x8] sm:$0xff]  ;;  %v435_v7 = vld [vmem:[%s338_s13] sm:$0xff]  ;;  %s2270_s10 = sadd.s32 4294967295, %s1730_s30   ;;  %vm1077_vm1 = vcmask 72704  }
  0x95   : > { %1404 = vmatprep.mubr.msk.f32.mxu1 %vm441_vm0, %v437_v2  ;;  %v539_v4 = vld [vmem:[#allocation6] sm:$0xff]  ;;  %v438_v8 = vld [vmem:[%s338_s13 + $0x18] sm:$0xff]  ;;  %v436_v9 = vld [vmem:[%s338_s13 + $0x8] sm:$0xff]  ;;  %1401 = vmatprep.mubr.msk.f32.mxu0 %vm441_vm0, %v435_v7  ;;  %s1331_s11 = sshll.u32 %s2270_s10, 1 }
  0x96   : > { %v1421_v6 = vpack.c.bf16 %v540_v5, %v539_v4  ;;  %1437 = vmatprep.subr.bf16.mxu1 %v1417_v3  ;;  %1418 = vmatprep.subr.bf16.mxu0 %v1417_v3  ;;  %v626_v20 = vld [vmem:[#allocation7] sm:$0xff]  ;;  %v627_v27 = vld [vmem:[#allocation7 + $0x8] sm:$0xff]  ;;  %v628_v30 = vld [vmem:[#allocation9] sm:$0xff]  ;;  %p408_p7 = scmp.lt.s32.totalorder %s1331_s11, 7 }
  0x97   : > { %1438 = vmatpush3.bf16.msra.mxu1 %v1417_v3  ;;  %1420 = vmatpush3.bf16.msra.mxu0 %v1417_v3  ;;  %v796_v32 = vadd.f32 %v628_v30, %v626_v20  ;;  %v629_v33 = vld [vmem:[#allocation9 + $0x8] sm:$0xff] }
  0x98   : > { %1422 = vmatprep.subr.bf16.mxu1 %v1421_v6  ;;  %v797_v34 = vadd.f32 %v629_v33, %v627_v27  ;;  %s2276_s11 = smov (!%p408_p7, %s1331_s11), 7 }
  0x99   : > { %s2026_s12 = sshll.u32 %s2276_s11, 4 }
  0x9a   : > { %1405 = vmatmul.mubr.msk.f32.vlgmr.msra.gmra.mrb[0].mxu1 %vm441_vm0, %v438_v8  ;;  %1402 = vmatmul.mubr.msk.f32.vlgmr.msra.gmra.mrb[0].mxu0 %vm441_vm0, %v436_v9  ;;  %s2032_s14 = scalar_lea.vmem %s2252_s5, %s2026_s12  ;;  %s2048_s17 = scalar_lea.vmem %s2253_s6, %s2026_s12 }
  0x9b   : > { %1424 = vmatpush3.bf16.msra.mxu1 %v1421_v6  ;;  %1411 = vmatprep.mubr.msk.f32.mxu1 %vm441_vm0, %v435_v7  ;;  %s2146_s21 = scalar_lea.vmem %s2254_s7, %s2026_s12  ;;  %s2208_s15 = scalar_lea.vmem %s2255_s8, %s2026_s12 }
  0x9c   : > { %700 = vmatprep.mubr.f32.mxu0 %v1739_v10 }
  0x9e   : > { %1412 = vmatmul.mubr.msk.f32.vlgmr.msra.gmra.mrb[2].mxu1 %vm441_vm0, %v436_v9 }
  0x9f   : > { %1414 = vmatprep.mubr.msk.f32.mxu1 %vm441_vm0, %v437_v2 }
  0xa2   : > { %1415 = vmatmul.mubr.msk.f32.gmra.mrb[4].mxu1 %vm441_vm0, %v438_v8 }
  0xa3   : > { %783 = vmatprep.mubr.f32.mxu1 %v1739_v10 }
 0x16d   : > { %v1406_v11 = vpop.f32.mrb[0].mxu1  ;;  %v1403_v12 = vpop.f32.mrb[0].mxu0 }
 0x16e   : > { %v530_v13 = vpop.f32.mrb[1].mxu1  ;;  %v520_v14 = vpop.f32.mrb[1].mxu0 }
 0x16f   : > { %v1425_v15 = vpack.c.bf16 %v1406_v11, %v530_v13  ;;  %v1427_v16 = vpack.c.bf16 %v1403_v12, %v520_v14 }
 0x171   : > { %v1413_v17 = vpop.f32.mrb[2].mxu1  ;;  %1426 = vmatprep.subr.bf16.mxu0 %v1425_v15 }
 0x172   : > { %v800_v18 = vadd.f32 %v1413_v17, %v1403_v12  ;;  %v607_v19 = vpop.f32.mrb[3].mxu1  ;;  %1428 = vmatpush1.bf16.msra.mxu0 %v1427_v16 }
 0x173   : > { %v1431_v21 = vpack.c.bf16 %v1413_v17, %v607_v19  ;;  %v798_v22 = vadd.f32 %v607_v19, %v520_v14 }
 0x175   : > { %v1435_v23 = vpack.c.bf16 %v800_v18, %v798_v22  ;;  %v1416_v24 = vpop.f32.mrb[4].mxu1  ;;  %1351 = vmatmul.mubr.msk.f32.vlgmr.msra.gmra.mrb[2].mxu0 %vm441_vm0, %v626_v20 }
 0x176   : > { %v801_v25 = vadd.f32 %v1416_v24, %v1406_v11  ;;  %v617_v26 = vpop.f32.mrb[5].mxu1  ;;  %706 = vmatprep.mubr.f32.mxu0 %v1739_v10 }
 0x177   : > { %v1429_v28 = vpack.c.bf16 %v1416_v24, %v617_v26  ;;  %v799_v29 = vadd.f32 %v617_v26, %v530_v13 }
 0x179   : > { %v1433_v31 = vpack.c.bf16 %v801_v25, %v799_v29  ;;  %1430 = vmatprep.subr.bf16.mxu1 %v1429_v28  ;;  %1352 = vmatmul.mubr.msk.f32.gmra.mrb[4].mxu0 %vm441_vm0, %v627_v27 }
 0x17a   : > { %1432 = vmatpush1.bf16.msra.mxu1 %v1431_v21  ;;  %872 = vmatprep.mubr.f32.mxu0 %v1739_v10 }
 0x17b   : > { %1434 = vmatprep.subr.bf16.mxu0 %v1433_v31 }
 0x17c   : > { %1436 = vmatpush1.bf16.msra.mxu0 %v1435_v23 }
 0x17d   : > { %1353 = vmatmul.mubr.msk.f32.vlgmr.msra.gmra.mrb[6].mxu1 %vm441_vm0, %v628_v30 }
 0x17e   : > { %789 = vmatprep.mubr.f32.mxu1 %v1739_v10 }
 0x17f   : > { %1355 = vmatmul.mubr.msk.f32.vlgmr.msra.gmra.mrb[6].mxu0 %vm441_vm0, %v796_v32 }
 0x180   : > { %878 = vmatprep.mubr.f32.mxu0 %v1739_v10 }
 0x181   : > { %1354 = vmatmul.mubr.msk.f32.gmra.mrb[8].mxu1 %vm441_vm0, %v629_v33 }
 0x183   : > { %1356 = vmatmul.mubr.msk.f32.gmra.mrb[8].mxu0 %vm441_vm0, %v797_v34 }
 0x248   : > { %v702_v35 = vpop.f32.mrb[2].mxu0 }
 0x249   : > { %v704_v36 = vpop.f32.mrb[3].mxu0 }
 0x24c   : > { %v708_v37 = vpop.f32.mrb[4].mxu0 }
 0x24d   : > { %v710_v38 = vpop.f32.mrb[5].mxu0 }
 0x250   : > { %v785_v39 = vpop.f32.mrb[6].mxu1 }
 0x251   : > { %v2034_v40 = vsub.f32 %v702_v35, %v785_v39  ;;  %v787_v41 = vpop.f32.mrb[7].mxu1 }
 0x252   : > { %v2036_v42 = vsub.f32 %v704_v36, %v787_v41  ;;  %v874_v43 = vpop.f32.mrb[6].mxu0 }
 0x253   : > { %1078 = vst.msk [vmem:[%s2032_s14] sm:$0xff] %vm1077_vm1, %v2034_v40  ;;  %v889_v44 = vsub.f32 %v874_v43, %v702_v35  ;;  %v876_v45 = vpop.f32.mrb[7].mxu0  ;;  %v897_v54 = vmul.f32 %v2034_v40, %v2034_v40  ;;  %v2061_v55 = vand.u32 2147483647, %v2034_v40 }
 0x254   : > { %1369 = vst.msk [vmem:[%s2032_s14 + $0x10] sm:$0xff] %vm1077_vm1, %v2036_v42  ;;  %v890_v46 = vsub.f32 %v876_v45, %v704_v36  ;;  %v791_v47 = vpop.f32.mrb[8].mxu1  ;;  %v898_v59 = vmul.f32 %v2036_v42, %v2036_v42  ;;  %v2077_v60 = vand.u32 2147483647, %v2036_v42 }
 0x255   : > { %v2050_v48 = vsub.f32 %v889_v44, %v785_v39  ;;  %v2052_v49 = vsub.f32 %v708_v37, %v791_v47  ;;  %v793_v50 = vpop.f32.mrb[9].mxu1 }
 0x256   : > { %v2054_v51 = vsub.f32 %v890_v46, %v787_v41  ;;  %v2056_v52 = vsub.f32 %v710_v38, %v793_v50  ;;  %v880_v53 = vpop.f32.mrb[8].mxu0 }
 0x257   : > { %v901_v56 = vmul.f32 %v2050_v48, %v2050_v48  ;;  %v2066_v57 = vand.u32 2147483647, %v2050_v48  ;;  %1080 = vst.msk [vmem:[%s2048_s17] sm:$0xff] %vm1077_vm1, %v2050_v48  ;;  %1079 = vst.msk [vmem:[%s2032_s14 + $0x8] sm:$0xff] %vm1077_vm1, %v2052_v49  ;;  %v882_v58 = vpop.f32.mrb[9].mxu0  ;;  %v891_v7 = vsub.f32 %v880_v53, %v708_v37  ;;  %v899_v11 = vmul.f32 %v2052_v49, %v2052_v49 }
 0x258   : > { %v902_v61 = vmul.f32 %v2054_v51, %v2054_v51  ;;  %v2082_v62 = vand.u32 2147483647, %v2054_v51  ;;  %1371 = vst.msk [vmem:[%s2048_s17 + $0x10] sm:$0xff] %vm1077_vm1, %v2054_v51  ;;  %1370 = vst.msk [vmem:[%s2032_s14 + $0x18] sm:$0xff] %vm1077_vm1, %v2056_v52  ;;  %v892_v8 = vsub.f32 %v882_v58, %v710_v38  ;;  %v2109_v12 = vand.u32 2147483647, %v2052_v49 }
 0x259   : > { %v905_v63 = vadd.f32 %v901_v56, %v897_v54  ;;  %v945_v0 = vmin.f32 %v2061_v55, %v2066_v57  ;;  %v949_v1 = vmax.f32 %v2061_v55, %v2066_v57  ;;  %vm1041_vm2 = vcmp.gt.f32.partialorder %v2066_v57, %v2061_v55 }
 0x25a   : > { %v906_v2 = vadd.f32 %v902_v61, %v898_v59  ;;  %v946_v3 = vmin.f32 %v2077_v60, %v2082_v62  ;;  %v950_v4 = vmax.f32 %v2077_v60, %v2082_v62  ;;  %vm1042_vm3 = vcmp.gt.f32.partialorder %v2082_v62, %v2077_v60 }
 0x25b   : > { %1522 = vrsqrt.f32 %v905_v63  ;;  %vm953_vm4 = vcmp.eq.f32.partialorder %v949_v1, 0.0  ;;  %v2102_v9 = vsub.f32 %v891_v7, %v791_v47  ;;  %v2104_v10 = vsub.f32 %v892_v8, %v793_v50 }
 0x25c   : > { %1524 = vrsqrt.f32 %v906_v2  ;;  %v957_v5 = vsel %vm953_vm4, 1.0, %v949_v1  ;;  %vm954_vm5 = vcmp.eq.f32.partialorder %v950_v4, 0.0  ;;  %vm911_vm6 = vcmp.eq.f32.partialorder %v905_v63, inf }
 0x25d   : > { %1526 = vrcp.f32 %v957_v5  ;;  %v958_v6 = vsel %vm954_vm5, 1.0, %v950_v4  ;;  %vm913_vm7 = vcmp.eq.f32.partialorder %v905_v63, 0.0  ;;  %v903_v13 = vmul.f32 %v2102_v9, %v2102_v9  ;;  %1081 = vst.msk [vmem:[%s2048_s17 + $0x8] sm:$0xff] %vm1077_vm1, %v2102_v9  ;;  %1372 = vst.msk [vmem:[%s2048_s17 + $0x18] sm:$0xff] %vm1077_vm1, %v2104_v10 }
 0x25e   : > { %1528 = vrcp.f32 %v958_v6  ;;  %v2114_v14 = vand.u32 2147483647, %v2102_v9  ;;  %v904_v15 = vmul.f32 %v2104_v10, %v2104_v10  ;;  %v914_v16 = vand.u32 2147483648, %v905_v63 }
 0x25f   : > { %v900_v17 = vmul.f32 %v2056_v52, %v2056_v52  ;;  %v2124_v18 = vand.u32 2147483647, %v2056_v52  ;;  %v2127_v19 = vand.u32 2147483647, %v2104_v10  ;;  %v907_v21 = vadd.f32 %v903_v13, %v899_v11 }
 0x260   : > { %v947_v22 = vmin.f32 %v2109_v12, %v2114_v14  ;;  %v951_v23 = vmax.f32 %v2109_v12, %v2114_v14  ;;  %vm1043_vm8 = vcmp.gt.f32.partialorder %v2114_v14, %v2109_v12  ;;  %vm918_vm9 = vcmp.eq.f32.partialorder %v906_v2, inf }
 0x261   : > { %v908_v26 = vadd.f32 %v904_v15, %v900_v17  ;;  %v948_v27 = vmin.f32 %v2124_v18, %v2127_v19  ;;  %v952_v28 = vmax.f32 %v2124_v18, %v2127_v19  ;;  %vm920_vm10 = vcmp.eq.f32.partialorder %v906_v2, 0.0 }
 0x262   : > { %1530 = vrsqrt.f32 %v907_v21  ;;  %v921_v32 = vand.u32 2147483648, %v906_v2  ;;  %vm955_vm11 = vcmp.eq.f32.partialorder %v951_v23, 0.0  ;;  %vm1044_vm13 = vcmp.gt.f32.partialorder %v2127_v19, %v2124_v18 }
 0x263   : > { %1532 = vrsqrt.f32 %v908_v26  ;;  %v959_v37 = vsel %vm955_vm11, 1.0, %v951_v23  ;;  %vm956_vm12 = vcmp.eq.f32.partialorder %v952_v28, 0.0  ;;  %vm925_vm14 = vcmp.eq.f32.partialorder %v907_v21, inf }
 0x264   : > { %1534 = vrcp.f32 %v959_v37  ;;  %v960_v44 = vsel %vm956_vm12, 1.0, %v952_v28  ;;  %v928_v50 = vand.u32 2147483648, %v907_v21  ;;  %vm927_vm15 = vcmp.eq.f32.partialorder %v907_v21, 0.0 }
 0x265   : > { %v1523_v20 = vpop.eup %1522  ;;  %vm932_vm0 = vcmp.eq.f32.partialorder %v908_v26, inf  ;;  %v935_v58 = vand.u32 2147483648, %v908_v26  ;;  %vm934_vm4 = vcmp.eq.f32.partialorder %v908_v26, 0.0  ;;  %vm1054_vm11 = vcmp.lt.f32.partialorder %v2036_v42, 0.0 }
 0x266   : > { %v1525_v24 = vpop.eup %1524  ;;  %v910_v25 = vmul.f32 %v1523_v20, %v905_v63  ;;  %vm1055_vm12 = vcmp.lt.f32.partialorder %v2052_v49, 0.0 }
 0x267   : > { %v917_v29 = vmul.f32 %v1525_v24, %v906_v2  ;;  %v1527_v30 = vpop.eup %1526 }
 0x268   : > { %v912_v31 = vsel %vm911_vm6, %v905_v63, %v910_v25  ;;  %v1529_v33 = vpop.eup %1528  ;;  %v2150_v35 = vmul.f32 %v1527_v30, %v945_v0 }
 0x269   : > { %v915_v34 = vsel %vm913_vm7, %v914_v16, %v912_v31  ;;  %v919_v36 = vsel %vm918_vm9, %v906_v2, %v917_v29  ;;  %v2154_v39 = vmul.f32 %v1529_v33, %v946_v3 }
 0x26a   : > { %1082 = vst.msk [vmem:[%s2146_s21] sm:$0xff] %vm1077_vm1, %v915_v34  ;;  %v922_v38 = vsel %vm920_vm10, %v921_v32, %v919_v36  ;;  %v977_v41 = vadd.f32 1.0, %v2150_v35  ;;  %v1357_v0 = vadd.f32 -1.0, %v2150_v35  ;;  %vm969_vm5 = vcmp.gt.f32.partialorder %v2150_v35, 0.41421357 }
 0x26b   : > { %1373 = vst.msk [vmem:[%s2146_s21 + $0x10] sm:$0xff] %vm1077_vm1, %v922_v38  ;;  %v978_v43 = vadd.f32 1.0, %v2154_v39  ;;  %v1358_v3 = vadd.f32 -1.0, %v2154_v39  ;;  %vm970_vm6 = vcmp.gt.f32.partialorder %v2154_v39, 0.41421357  ;;  %vm1053_vm10 = vcmp.lt.f32.partialorder %v2034_v40, 0.0 }
 0x26c   : > { %1536 = vrcp.f32 %v977_v41  ;;  %v1531_v45 = vpop.eup %1530 }
 0x26d   : > { %1538 = vrcp.f32 %v978_v43  ;;  %v1533_v46 = vpop.eup %1532  ;;  %v924_v47 = vmul.f32 %v1531_v45, %v907_v21 }
 0x26e   : > { %1540 = vrcp.f32 %v960_v44  ;;  %v931_v53 = vmul.f32 %v1533_v46, %v908_v26  ;;  %v1535_v54 = vpop.eup %1534 }
 0x26f   : > { %v926_v56 = vsel %vm925_vm14, %v907_v21, %v924_v47  ;;  %v2162_v61 = vmul.f32 %v1535_v54, %v947_v22  ;;  %vm1067_vm14 = vcmp.lt.f32.partialorder %v2102_v9, 0.0 }
 0x270   : > { %v929_v59 = vsel %vm927_vm15, %v928_v50, %v926_v56  ;;  %v933_v63 = vsel %vm932_vm0, %v908_v26, %v931_v53  ;;  %vm1068_vm15 = vcmp.lt.f32.partialorder %v2104_v10, 0.0 }
 0x271   : > { %1083 = vst.msk [vmem:[%s2146_s21 + $0x8] sm:$0xff] %vm1077_vm1, %v929_v59  ;;  %v936_v1 = vsel %vm934_vm4, %v935_v58, %v933_v63  ;;  %v979_v4 = vadd.f32 1.0, %v2162_v61  ;;  %v1359_v28 = vadd.f32 -1.0, %v2162_v61  ;;  %vm971_vm7 = vcmp.gt.f32.partialorder %v2162_v61, 0.41421357 }
 0x272   : > { %1374 = vst.msk [vmem:[%s2146_s21 + $0x18] sm:$0xff] %vm1077_vm1, %v936_v1 }
 0x273   : > { %1542 = vrcp.f32 %v979_v4 }
 0x276   : > { %v1537_v2 = vpop.eup %1536 }
 0x277   : > { %v1539_v5 = vpop.eup %1538  ;;  %v985_v6 = vmul.f32 %v1537_v2, %v1357_v0 }
 0x278   : > { %v1541_v7 = vpop.eup %1540  ;;  %v986_v8 = vmul.f32 %v1539_v5, %v1358_v3 }
 0x279   : > { %v989_v11 = vsel %vm969_vm5, %v985_v6, %v2150_v35  ;;  %v2176_v13 = vmul.f32 %v1541_v7, %v948_v27 }
 0x27a   : > { %v993_v15 = vmul.f32 %v989_v11, %v989_v11  ;;  %v990_v16 = vsel %vm970_vm6, %v986_v8, %v2154_v39 }
 0x27b   : > { %v994_v17 = vmul.f32 %v990_v16, %v990_v16  ;;  %v980_v20 = vadd.f32 1.0, %v2176_v13  ;;  %v1360_v38 = vadd.f32 -1.0, %v2176_v13  ;;  %vm972_vm9 = vcmp.gt.f32.partialorder %v2176_v13, 0.41421357 }
 0x27c   : > { %v997_v21 = vmul.f32 0.080537446, %v993_v15 }
 0x27d   : > { %v998_v22 = vmul.f32 0.080537446, %v994_v17  ;;  %1544 = vrcp.f32 %v980_v20  ;;  %v1543_v29 = vpop.eup %1542 }
 0x27e   : > { %v1361_v23 = vadd.f32 -0.13877685, %v997_v21  ;;  %v987_v31 = vmul.f32 %v1543_v29, %v1359_v28 }
 0x27f   : > { %v1362_v24 = vadd.f32 -0.13877685, %v998_v22 }
 0x280   : > { %v1005_v25 = vmul.f32 %v1361_v23, %v993_v15  ;;  %v991_v34 = vsel %vm971_vm7, %v987_v31, %v2162_v61 }
 0x281   : > { %v1006_v26 = vmul.f32 %v1362_v24, %v994_v17  ;;  %v995_v37 = vmul.f32 %v991_v34, %v991_v34 }
 0x282   : > { %v1009_v27 = vadd.f32 0.19977711, %v1005_v25 }
 0x283   : > { %v1010_v30 = vadd.f32 0.19977711, %v1006_v26  ;;  %v999_v45 = vmul.f32 0.080537446, %v995_v37 }
 0x284   : > { %v1013_v32 = vmul.f32 %v1009_v27, %v993_v15 }
 0x285   : > { %v1014_v33 = vmul.f32 %v1010_v30, %v994_v17  ;;  %v1363_v53 = vadd.f32 -0.13877685, %v999_v45 }
 0x286   : > { %v1365_v36 = vadd.f32 -0.3333295, %v1013_v32 }
 0x287   : > { %v1545_v41 = vpop.eup %1544  ;;  %v1366_v43 = vadd.f32 -0.3333295, %v1014_v33  ;;  %v1007_v63 = vmul.f32 %v1363_v53, %v995_v37 }
 0x288   : > { %v1021_v44 = vmul.f32 %v1365_v36, %v993_v15  ;;  %v988_v46 = vmul.f32 %v1545_v41, %v1360_v38 }
 0x289   : > { %v1022_v47 = vmul.f32 %v1366_v43, %v994_v17  ;;  %v1011_v3 = vadd.f32 0.19977711, %v1007_v63 }
 0x28a   : > { %v1025_v50 = vmul.f32 %v1021_v44, %v989_v11  ;;  %v992_v54 = vsel %vm972_vm9, %v988_v46, %v2176_v13 }
 0x28b   : > { %v1026_v56 = vmul.f32 %v1022_v47, %v990_v16  ;;  %v996_v58 = vmul.f32 %v992_v54, %v992_v54  ;;  %v1015_v7 = vmul.f32 %v1011_v3, %v995_v37 }
 0x28c   : > { %v1029_v59 = vadd.f32 %v1025_v50, %v989_v11 }
 0x28d   : > { %v1030_v0 = vadd.f32 %v1026_v56, %v990_v16  ;;  %v1000_v1 = vmul.f32 0.080537446, %v996_v58  ;;  %v1367_v21 = vadd.f32 -0.3333295, %v1015_v7 }
 0x28e   : > { %v1033_v2 = vadd.f32 0.7853982, %v1029_v59 }
 0x28f   : > { %v1034_v4 = vadd.f32 0.7853982, %v1030_v0  ;;  %v1364_v5 = vadd.f32 -0.13877685, %v1000_v1  ;;  %v1023_v23 = vmul.f32 %v1367_v21, %v995_v37 }
 0x290   : > { %v1037_v6 = vsel %vm969_vm5, %v1033_v2, %v1029_v59 }
 0x291   : > { %v1045_v8 = vsub.f32 1.5707964, %v1037_v6  ;;  %v1038_v15 = vsel %vm970_vm6, %v1034_v4, %v1030_v0  ;;  %v1008_v17 = vmul.f32 %v1364_v5, %v996_v58  ;;  %v1027_v26 = vmul.f32 %v1023_v23, %v991_v34 }
 0x292   : > { %v1046_v20 = vsub.f32 1.5707964, %v1038_v15 }
 0x293   : > { %v1049_v11 = vsel %vm1041_vm2, %v1045_v8, %v1037_v6  ;;  %v1012_v16 = vadd.f32 0.19977711, %v1008_v17  ;;  %vm1065_vm2 = vcmp.lt.f32.partialorder %v2050_v48, 0.0  ;;  %v1031_v40 = vadd.f32 %v1027_v26, %v991_v34 }
 0x294   : > { %v1057_v22 = vsub.f32 3.1415927, %v1049_v11  ;;  %v1050_v35 = vsel %vm1042_vm3, %v1046_v20, %v1038_v15  ;;  %vm1066_vm3 = vcmp.lt.f32.partialorder %v2054_v51, 0.0 }
 0x295   : > { %v1058_v24 = vsub.f32 3.1415927, %v1050_v35  ;;  %v1016_v39 = vmul.f32 %v1012_v16, %v996_v58  ;;  %v1035_v27 = vadd.f32 0.7853982, %v1031_v40 }
 0x296   : > { %v1061_v25 = vsel %vm1053_vm10, %v1057_v22, %v1049_v11 }
 0x297   : > { %v1069_v55 = vsub.f32 0.0, %v1061_v25  ;;  %v1062_v57 = vsel %vm1054_vm11, %v1058_v24, %v1050_v35  ;;  %v1368_v60 = vadd.f32 -0.3333295, %v1016_v39  ;;  %v1039_v31 = vsel %vm971_vm7, %v1035_v27, %v1031_v40 }
 0x298   : > { %v1070_v62 = vsub.f32 0.0, %v1062_v57  ;;  %v1047_v32 = vsub.f32 1.5707964, %v1039_v31 }
 0x299   : > { %v1073_v28 = vsel %vm1065_vm2, %v1069_v55, %v1061_v25  ;;  %v1024_v42 = vmul.f32 %v1368_v60, %v996_v58 }
 0x29a   : > { %1084 = vst.msk [vmem:[%s2208_s15] sm:$0xff] %vm1077_vm1, %v1073_v28  ;;  %v1074_v29 = vsel %vm1066_vm3, %v1070_v62, %v1062_v57  ;;  %v1051_v48 = vsel %vm1043_vm8, %v1047_v32, %v1039_v31  ;;  %vm1056_vm8 = vcmp.lt.f32.partialorder %v2056_v52, 0.0 }
 0x29b   : > { %1375 = vst.msk [vmem:[%s2208_s15 + $0x10] sm:$0xff] %vm1077_vm1, %v1074_v29  ;;  %v1028_v30 = vmul.f32 %v1024_v42, %v992_v54  ;;  %v1059_v51 = vsub.f32 3.1415927, %v1051_v48 }
 0x29d   : > { %v1032_v33 = vadd.f32 %v1028_v30, %v992_v54  ;;  %v1063_v37 = vsel %vm1055_vm12, %v1059_v51, %v1051_v48 }
 0x29e   : > { %v1071_v41 = vsub.f32 0.0, %v1063_v37 }
 0x29f   : > { %v1036_v34 = vadd.f32 0.7853982, %v1032_v33 }
 0x2a0   : > { %v1075_v43 = vsel %vm1067_vm14, %v1071_v41, %v1063_v37 }
 0x2a1   : > { %v1040_v36 = vsel %vm972_vm9, %v1036_v34, %v1032_v33  ;;  %1085 = vst.msk [vmem:[%s2208_s15 + $0x8] sm:$0xff] %vm1077_vm1, %v1075_v43 }
 0x2a2   : > { %v1048_v38 = vsub.f32 1.5707964, %v1040_v36 }
 0x2a4   : > { %v1052_v61 = vsel %vm1044_vm13, %v1048_v38, %v1040_v36 }
 0x2a5   : > { %v1060_v12 = vsub.f32 3.1415927, %v1052_v61 }
 0x2a7   : > { %v1064_v14 = vsel %vm1056_vm8, %v1060_v12, %v1052_v61 }
 0x2a8   : > { %v1072_v49 = vsub.f32 0.0, %v1064_v14 }
 0x2aa   : > { %v1076_v13 = vsel %vm1068_vm15, %v1072_v49, %v1064_v14 }
 0x2ab   : > { %1376 = vst.msk [vmem:[%s2208_s15 + $0x18] sm:$0xff] %vm1077_vm1, %v1076_v13 }
 0x2ac PF: > { %p21_p11 = scmp.ge.s32.totalorder %s1939_s25, 6   ;;  %s2271_s27 = smov %s1722_s28 }
 0x2ad   : > { %s2272_s28 = smov %s1726_s29  ;;  %s2273_s29 = smov %s1950_s23 }
 0x2ae   : > { %s2274_s30 = smov %s1939_s25  ;;  %23 = sbr.rel (!%p21_p11) target bundleno = 5 (0x5), region = 136 }
 0x2b5   :  { %1179 = vsyncpa [#allocation3], 1 }
 0x2b6   :  { %1181 = vsyncpa [#allocation3 + $0x1], 1 }
 0x2b7   :  { %1182 = vsyncpa [#allocation5], 1 }
 0x2b8   :  { %1183 = vsyncpa [#allocation8], 1 }

</bundles_post_ra>
